<compile_context>
chip_gen: v6e
topology: v6e:2x2x1
jax: 0.10.0
libtpu: 0.0.40
codegen_flags: <defaults>
</compile_context>

<pallas_src>
import functools

import jax
import jax.numpy as jnp
from jax import lax
from jax.experimental import pallas as pl
from jax.experimental.pallas import tpu as pltpu


def _spatial_attention_kernel(x_ref, wp_ref, o_ref, *, H, W, K, TN):
    """One grid step: TN batch elements, spatial dims flattened to H*W lanes.

    x_ref:  (TN, C, H*W)   VMEM input block
    wp_ref: (2*K*K, H*W)   VMEM weight planes: rows [0, K*K) = avg-branch
                           weights (already /C) * zero-pad edge mask,
                           rows [K*K, 2*K*K) = max-branch weights * mask.
    o_ref:  (TN, 1, H*W)   VMEM output block (attention map, flat spatial)
    """
    P = K // 2
    HW = H * W
    KK = K * K

    # Channel sum / max per sample, assembled into dense (TN, HW) tiles.
    s_rows, m_rows = [], []
    for i in range(TN):                                     # static unroll
        xi = x_ref[i].astype(jnp.float32)                   # (C, HW)
        s_rows.append(jnp.sum(xi, axis=0, keepdims=True))   # (1, HW) sum (= mean*C)
        m_rows.append(jnp.max(xi, axis=0, keepdims=True))   # (1, HW) max
    s = jnp.concatenate(s_rows, axis=0) if TN > 1 else s_rows[0]   # (TN, HW)
    m = jnp.concatenate(m_rows, axis=0) if TN > 1 else m_rows[0]   # (TN, HW)

    # Conv taps: roll the whole (TN, HW) tile per tap (XLU), then MAC against
    # the per-tap weight-plane rows (lane-aligned sublane broadcast, VPU).
    acc = None
    for dy in range(K):
        for dx in range(K):
            t = dy * K + dx
            shift = (dy - P) * W + (dx - P)                 # tap[p] = feat[p + shift]
            if shift == 0:
                s_t, m_t = s, m
            else:
                r = (-shift) % HW                           # left-roll by `shift`
                s_t = pltpu.roll(s, r, axis=1)              # XLU rotate (VPU stays free)
                m_t = pltpu.roll(m, r, axis=1)
            term = wp_ref[t:t + 1, :] * s_t + wp_ref[KK + t:KK + t + 1, :] * m_t
            acc = term if acc is None else acc + term

    att = jax.nn.sigmoid(acc).astype(o_ref.dtype)           # (TN, HW)
    for i in range(TN):                                     # row i -> plane i
        o_ref[i] = att[i:i + 1, :]


def _pick_block_batch(n, bytes_per_sample, target_bytes=2 * 1024 * 1024, max_unroll=32):
    """Largest divisor of n whose input block stays under the byte/unroll budget."""
    tn = int(max(1, min(n, max_unroll, target_bytes // max(bytes_per_sample, 1))))
    while n % tn:
        tn -= 1
    return tn


@functools.partial(jax.jit, static_argnames=("k",))
def spatial_attention(ftr, weight, k=3):
    """ftr: (N, C, H, W). weight: (1, 2, k, k) conv weight (no bias).

    Returns sigmoid(conv2d(concat([mean_C(ftr), max_C(ftr)]), weight, pad=k//2))
    of shape (N, 1, H, W), matching the PyTorch SpatialAttention forward.
    """
    N, C, H, W = ftr.shape
    P = k // 2
    HW = H * W

    # Lane-dense view of the input: free reshape (contiguous trailing dims).
    x = ftr.reshape(N, C, HW)

    # SAME zero-padding edge masks, one per tap offset, in flattened layout.
    yy, xx = jnp.meshgrid(jnp.arange(H), jnp.arange(W), indexing="ij")
    masks = []
    for dy in range(k):
        for dx in range(k):
            oy, ox = dy - P, dx - P
            valid = ((yy + oy >= 0) & (yy + oy < H) &
                     (xx + ox >= 0) & (xx + ox < W))
            masks.append(valid.reshape(HW))
    edge_mask = jnp.stack(masks).astype(jnp.float32)                 # (k*k, HW)

    # Fold conv weights (avg branch also folds the 1/C of the mean) into the
    # edge masks -> one (2*k*k, HW) weight-plane table.
    w_avg = (weight[0, 0].astype(jnp.float32) / C).reshape(-1)       # (k*k,)
    w_max = weight[0, 1].astype(jnp.float32).reshape(-1)             # (k*k,)
    wplanes = jnp.concatenate([w_avg[:, None] * edge_mask,
                               w_max[:, None] * edge_mask], axis=0)  # (2*k*k, HW)

    # Several batch elements per grid step so each step moves a decent block.
    tn = _pick_block_batch(N, C * HW * ftr.dtype.itemsize)
    grid = (N // tn,)

    kernel = functools.partial(_spatial_attention_kernel, H=H, W=W, K=k, TN=tn)

    out = pl.pallas_call(
        kernel,
        out_shape=jax.ShapeDtypeStruct((N, 1, HW), ftr.dtype),
        grid_spec=pltpu.PrefetchScalarGridSpec(
            num_scalar_prefetch=0,
            grid=grid,
            in_specs=[
                pl.BlockSpec((tn, C, HW), lambda n: (n, 0, 0)),
                pl.BlockSpec((2 * k * k, HW), lambda n: (0, 0)),
            ],
            out_specs=pl.BlockSpec((tn, 1, HW), lambda n: (n, 0, 0)),
        ),
        compiler_params=pltpu.CompilerParams(
            dimension_semantics=("parallel",),          # shard batch blocks over TCs (v7x)
            vmem_limit_bytes=32 * 1024 * 1024,          # raise v5e's 16 MiB scoped default
        ),
    )(x, wplanes)

    return out.reshape(N, 1, H, W)


def _reference(ftr, weight):
    """Pure-JAX reference matching the PyTorch forward."""
    avg = jnp.mean(ftr, axis=1, keepdims=True)
    mx = jnp.max(ftr, axis=1, keepdims=True)
    cat = jnp.concatenate([avg, mx], axis=1)
    p = weight.shape[-1] // 2
    conv = lax.conv_general_dilated(
        cat, weight, window_strides=(1, 1), padding=((p, p), (p, p)),
        dimension_numbers=("NCHW", "OIHW", "NCHW"))
    return jax.nn.sigmoid(conv)


if __name__ == "__main__":
    key = jax.random.PRNGKey(0)
    kx, kw = jax.random.split(key)

    N, C, H, W, K = 2, 4, 16, 16, 3
    ftr = jax.random.normal(kx, (N, C, H, W), dtype=jnp.float32)
    # Deterministic synthetic conv weight, shape (out=1, in=2, k, k), no bias.
    weight = 0.1 * jax.random.normal(kw, (1, 2, K, K), dtype=jnp.float32)

    out = jax.block_until_ready(spatial_attention(ftr, weight, k=K))
    ref = jax.block_until_ready(_reference(ftr, weight))

    assert out.shape == (N, 1, H, W), out.shape
    assert jnp.allclose(out, ref, atol=1e-5, rtol=1e-5), (
        float(jnp.max(jnp.abs(out - ref))))
    print("KERNEL_OK")
</pallas_src>

<mosaic_0001>
module attributes {stable_mosaic.version = 11 : i64} {
  func.func @_spatial_attention_kernel(%arg0: i32, %arg1: memref<2x4x256xf32, #tpu.memory_space<vmem>>, %arg2: memref<18x256xf32, #tpu.memory_space<vmem>>, %arg3: memref<2x1x256xf32, #tpu.memory_space<vmem>>) attributes {dimension_semantics = [#tpu.dimension_semantics<parallel>], iteration_bounds = array<i64: 1>, scalar_prefetch = 0 : i64, scratch_operands = 0 : i64, tpu.core_type = #tpu.core_type<tc>, window_params = [{transform_indices = @transform_0, window_bounds = array<i64: 2, 4, 256>}, {pipeline_mode = #tpu.pipeline_mode<synchronous>, transform_indices = @transform_1, window_bounds = array<i64: 18, 256>}, {transform_indices = @transform_2, window_bounds = array<i64: 2, 1, 256>}]} {
    %c0 = arith.constant 0 : index
    %c0_0 = arith.constant 0 : index
    %c0_1 = arith.constant 0 : index
    %0 = vector.load %arg1[%c0, %c0_0, %c0_1] : memref<2x4x256xf32, #tpu.memory_space<vmem>>, vector<1x4x256xf32>
    %1 = vector.shape_cast %0 : vector<1x4x256xf32> to vector<4x256xf32>
    %cst = arith.constant dense<0.000000e+00> : vector<256xf32>
    %2 = vector.multi_reduction <add>, %1, %cst [0] : vector<4x256xf32> to vector<256xf32>
    %3 = vector.shape_cast %2 : vector<256xf32> to vector<1x256xf32>
    %cst_2 = arith.constant dense<0xFF800000> : vector<256xf32>
    %4 = vector.multi_reduction <maximumf>, %1, %cst_2 [0] : vector<4x256xf32> to vector<256xf32>
    %5 = vector.shape_cast %4 : vector<256xf32> to vector<1x256xf32>
    %c1 = arith.constant 1 : index
    %c0_3 = arith.constant 0 : index
    %c0_4 = arith.constant 0 : index
    %6 = vector.load %arg1[%c1, %c0_3, %c0_4] : memref<2x4x256xf32, #tpu.memory_space<vmem>>, vector<1x4x256xf32>
    %7 = vector.shape_cast %6 : vector<1x4x256xf32> to vector<4x256xf32>
    %cst_5 = arith.constant dense<0.000000e+00> : vector<256xf32>
    %8 = vector.multi_reduction <add>, %7, %cst_5 [0] : vector<4x256xf32> to vector<256xf32>
    %9 = vector.shape_cast %8 : vector<256xf32> to vector<1x256xf32>
    %cst_6 = arith.constant dense<0xFF800000> : vector<256xf32>
    %10 = vector.multi_reduction <maximumf>, %7, %cst_6 [0] : vector<4x256xf32> to vector<256xf32>
    %11 = vector.shape_cast %10 : vector<256xf32> to vector<1x256xf32>
    %12 = tpu.concatenate %3, %9 in 0 : vector<1x256xf32>, vector<1x256xf32> -> vector<2x256xf32>
    %13 = tpu.concatenate %5, %11 in 0 : vector<1x256xf32>, vector<1x256xf32> -> vector<2x256xf32>
    %c17_i32 = arith.constant 17 : i32
    %14 = tpu.dynamic_rotate %12 by %c17_i32 dim 1 : vector<2x256xf32>, i32 -> vector<2x256xf32>
    %c17_i32_7 = arith.constant 17 : i32
    %15 = tpu.dynamic_rotate %13 by %c17_i32_7 dim 1 : vector<2x256xf32>, i32 -> vector<2x256xf32>
    %c0_8 = arith.constant 0 : index
    %c0_9 = arith.constant 0 : index
    %16 = vector.load %arg2[%c0_8, %c0_9] : memref<18x256xf32, #tpu.memory_space<vmem>>, vector<1x256xf32>
    %17 = vector.broadcast %16 : vector<1x256xf32> to vector<2x256xf32>
    %18 = arith.mulf %17, %14 : vector<2x256xf32>
    %c9 = arith.constant 9 : index
    %c0_10 = arith.constant 0 : index
    %19 = vector.load %arg2[%c9, %c0_10] : memref<18x256xf32, #tpu.memory_space<vmem>>, vector<1x256xf32>
    %20 = vector.broadcast %19 : vector<1x256xf32> to vector<2x256xf32>
    %21 = arith.mulf %20, %15 : vector<2x256xf32>
    %22 = arith.addf %18, %21 : vector<2x256xf32>
    %c16_i32 = arith.constant 16 : i32
    %23 = tpu.dynamic_rotate %12 by %c16_i32 dim 1 : vector<2x256xf32>, i32 -> vector<2x256xf32>
    %c16_i32_11 = arith.constant 16 : i32
    %24 = tpu.dynamic_rotate %13 by %c16_i32_11 dim 1 : vector<2x256xf32>, i32 -> vector<2x256xf32>
    %c1_12 = arith.constant 1 : index
    %c0_13 = arith.constant 0 : index
    %25 = vector.load %arg2[%c1_12, %c0_13] : memref<18x256xf32, #tpu.memory_space<vmem>>, vector<1x256xf32>
    %26 = vector.broadcast %25 : vector<1x256xf32> to vector<2x256xf32>
    %27 = arith.mulf %26, %23 : vector<2x256xf32>
    %c10 = arith.constant 10 : index
    %c0_14 = arith.constant 0 : index
    %28 = vector.load %arg2[%c10, %c0_14] : memref<18x256xf32, #tpu.memory_space<vmem>>, vector<1x256xf32>
    %29 = vector.broadcast %28 : vector<1x256xf32> to vector<2x256xf32>
    %30 = arith.mulf %29, %24 : vector<2x256xf32>
    %31 = arith.addf %27, %30 : vector<2x256xf32>
    %32 = arith.addf %22, %31 : vector<2x256xf32>
    %c15_i32 = arith.constant 15 : i32
    %33 = tpu.dynamic_rotate %12 by %c15_i32 dim 1 : vector<2x256xf32>, i32 -> vector<2x256xf32>
    %c15_i32_15 = arith.constant 15 : i32
    %34 = tpu.dynamic_rotate %13 by %c15_i32_15 dim 1 : vector<2x256xf32>, i32 -> vector<2x256xf32>
    %c2 = arith.constant 2 : index
    %c0_16 = arith.constant 0 : index
    %35 = vector.load %arg2[%c2, %c0_16] : memref<18x256xf32, #tpu.memory_space<vmem>>, vector<1x256xf32>
    %36 = vector.broadcast %35 : vector<1x256xf32> to vector<2x256xf32>
    %37 = arith.mulf %36, %33 : vector<2x256xf32>
    %c11 = arith.constant 11 : index
    %c0_17 = arith.constant 0 : index
    %38 = vector.load %arg2[%c11, %c0_17] : memref<18x256xf32, #tpu.memory_space<vmem>>, vector<1x256xf32>
    %39 = vector.broadcast %38 : vector<1x256xf32> to vector<2x256xf32>
    %40 = arith.mulf %39, %34 : vector<2x256xf32>
    %41 = arith.addf %37, %40 : vector<2x256xf32>
    %42 = arith.addf %32, %41 : vector<2x256xf32>
    %c1_i32 = arith.constant 1 : i32
    %43 = tpu.dynamic_rotate %12 by %c1_i32 dim 1 : vector<2x256xf32>, i32 -> vector<2x256xf32>
    %c1_i32_18 = arith.constant 1 : i32
    %44 = tpu.dynamic_rotate %13 by %c1_i32_18 dim 1 : vector<2x256xf32>, i32 -> vector<2x256xf32>
    %c3 = arith.constant 3 : index
    %c0_19 = arith.constant 0 : index
    %45 = vector.load %arg2[%c3, %c0_19] : memref<18x256xf32, #tpu.memory_space<vmem>>, vector<1x256xf32>
    %46 = vector.broadcast %45 : vector<1x256xf32> to vector<2x256xf32>
    %47 = arith.mulf %46, %43 : vector<2x256xf32>
    %c12 = arith.constant 12 : index
    %c0_20 = arith.constant 0 : index
    %48 = vector.load %arg2[%c12, %c0_20] : memref<18x256xf32, #tpu.memory_space<vmem>>, vector<1x256xf32>
    %49 = vector.broadcast %48 : vector<1x256xf32> to vector<2x256xf32>
    %50 = arith.mulf %49, %44 : vector<2x256xf32>
    %51 = arith.addf %47, %50 : vector<2x256xf32>
    %52 = arith.addf %42, %51 : vector<2x256xf32>
    %c4 = arith.constant 4 : index
    %c0_21 = arith.constant 0 : index
    %53 = vector.load %arg2[%c4, %c0_21] : memref<18x256xf32, #tpu.memory_space<vmem>>, vector<1x256xf32>
    %54 = vector.broadcast %53 : vector<1x256xf32> to vector<2x256xf32>
    %55 = arith.mulf %54, %12 : vector<2x256xf32>
    %c13 = arith.constant 13 : index
    %c0_22 = arith.constant 0 : index
    %56 = vector.load %arg2[%c13, %c0_22] : memref<18x256xf32, #tpu.memory_space<vmem>>, vector<1x256xf32>
    %57 = vector.broadcast %56 : vector<1x256xf32> to vector<2x256xf32>
    %58 = arith.mulf %57, %13 : vector<2x256xf32>
    %59 = arith.addf %55, %58 : vector<2x256xf32>
    %60 = arith.addf %52, %59 : vector<2x256xf32>
    %c255_i32 = arith.constant 255 : i32
    %61 = tpu.dynamic_rotate %12 by %c255_i32 dim 1 : vector<2x256xf32>, i32 -> vector<2x256xf32>
    %c255_i32_23 = arith.constant 255 : i32
    %62 = tpu.dynamic_rotate %13 by %c255_i32_23 dim 1 : vector<2x256xf32>, i32 -> vector<2x256xf32>
    %c5 = arith.constant 5 : index
    %c0_24 = arith.constant 0 : index
    %63 = vector.load %arg2[%c5, %c0_24] : memref<18x256xf32, #tpu.memory_space<vmem>>, vector<1x256xf32>
    %64 = vector.broadcast %63 : vector<1x256xf32> to vector<2x256xf32>
    %65 = arith.mulf %64, %61 : vector<2x256xf32>
    %c14 = arith.constant 14 : index
    %c0_25 = arith.constant 0 : index
    %66 = vector.load %arg2[%c14, %c0_25] : memref<18x256xf32, #tpu.memory_space<vmem>>, vector<1x256xf32>
    %67 = vector.broadcast %66 : vector<1x256xf32> to vector<2x256xf32>
    %68 = arith.mulf %67, %62 : vector<2x256xf32>
    %69 = arith.addf %65, %68 : vector<2x256xf32>
    %70 = arith.addf %60, %69 : vector<2x256xf32>
    %c241_i32 = arith.constant 241 : i32
    %71 = tpu.dynamic_rotate %12 by %c241_i32 dim 1 : vector<2x256xf32>, i32 -> vector<2x256xf32>
    %c241_i32_26 = arith.constant 241 : i32
    %72 = tpu.dynamic_rotate %13 by %c241_i32_26 dim 1 : vector<2x256xf32>, i32 -> vector<2x256xf32>
    %c6 = arith.constant 6 : index
    %c0_27 = arith.constant 0 : index
    %73 = vector.load %arg2[%c6, %c0_27] : memref<18x256xf32, #tpu.memory_space<vmem>>, vector<1x256xf32>
    %74 = vector.broadcast %73 : vector<1x256xf32> to vector<2x256xf32>
    %75 = arith.mulf %74, %71 : vector<2x256xf32>
    %c15 = arith.constant 15 : index
    %c0_28 = arith.constant 0 : index
    %76 = vector.load %arg2[%c15, %c0_28] : memref<18x256xf32, #tpu.memory_space<vmem>>, vector<1x256xf32>
    %77 = vector.broadcast %76 : vector<1x256xf32> to vector<2x256xf32>
    %78 = arith.mulf %77, %72 : vector<2x256xf32>
    %79 = arith.addf %75, %78 : vector<2x256xf32>
    %80 = arith.addf %70, %79 : vector<2x256xf32>
    %c240_i32 = arith.constant 240 : i32
    %81 = tpu.dynamic_rotate %12 by %c240_i32 dim 1 : vector<2x256xf32>, i32 -> vector<2x256xf32>
    %c240_i32_29 = arith.constant 240 : i32
    %82 = tpu.dynamic_rotate %13 by %c240_i32_29 dim 1 : vector<2x256xf32>, i32 -> vector<2x256xf32>
    %c7 = arith.constant 7 : index
    %c0_30 = arith.constant 0 : index
    %83 = vector.load %arg2[%c7, %c0_30] : memref<18x256xf32, #tpu.memory_space<vmem>>, vector<1x256xf32>
    %84 = vector.broadcast %83 : vector<1x256xf32> to vector<2x256xf32>
    %85 = arith.mulf %84, %81 : vector<2x256xf32>
    %c16 = arith.constant 16 : index
    %c0_31 = arith.constant 0 : index
    %86 = vector.load %arg2[%c16, %c0_31] : memref<18x256xf32, #tpu.memory_space<vmem>>, vector<1x256xf32>
    %87 = vector.broadcast %86 : vector<1x256xf32> to vector<2x256xf32>
    %88 = arith.mulf %87, %82 : vector<2x256xf32>
    %89 = arith.addf %85, %88 : vector<2x256xf32>
    %90 = arith.addf %80, %89 : vector<2x256xf32>
    %c239_i32 = arith.constant 239 : i32
    %91 = tpu.dynamic_rotate %12 by %c239_i32 dim 1 : vector<2x256xf32>, i32 -> vector<2x256xf32>
    %c239_i32_32 = arith.constant 239 : i32
    %92 = tpu.dynamic_rotate %13 by %c239_i32_32 dim 1 : vector<2x256xf32>, i32 -> vector<2x256xf32>
    %c8 = arith.constant 8 : index
    %c0_33 = arith.constant 0 : index
    %93 = vector.load %arg2[%c8, %c0_33] : memref<18x256xf32, #tpu.memory_space<vmem>>, vector<1x256xf32>
    %94 = vector.broadcast %93 : vector<1x256xf32> to vector<2x256xf32>
    %95 = arith.mulf %94, %91 : vector<2x256xf32>
    %c17 = arith.constant 17 : index
    %c0_34 = arith.constant 0 : index
    %96 = vector.load %arg2[%c17, %c0_34] : memref<18x256xf32, #tpu.memory_space<vmem>>, vector<1x256xf32>
    %97 = vector.broadcast %96 : vector<1x256xf32> to vector<2x256xf32>
    %98 = arith.mulf %97, %92 : vector<2x256xf32>
    %99 = arith.addf %95, %98 : vector<2x256xf32>
    %100 = arith.addf %90, %99 : vector<2x256xf32>
    %101 = arith.negf %100 : vector<2x256xf32>
    %102 = math.exp %101 : vector<2x256xf32>
    %cst_35 = arith.constant 1.000000e+00 : f32
    %103 = vector.broadcast %cst_35 : f32 to vector<2x256xf32>
    %104 = arith.addf %103, %102 : vector<2x256xf32>
    %105 = arith.divf %103, %104 : vector<2x256xf32>
    %106 = vector.extract_strided_slice %105 {offsets = [0, 0], sizes = [1, 256], strides = [1, 1]} : vector<2x256xf32> to vector<1x256xf32>
    %c0_36 = arith.constant 0 : index
    %c0_37 = arith.constant 0 : index
    %c0_38 = arith.constant 0 : index
    %107 = vector.load %arg3[%c0_36, %c0_37, %c0_38] : memref<2x1x256xf32, #tpu.memory_space<vmem>>, vector<1x1x256xf32>
    %108 = vector.shape_cast %107 : vector<1x1x256xf32> to vector<1x256xf32>
    %109 = vector.shape_cast %106 : vector<1x256xf32> to vector<1x1x256xf32>
    tpu.vector_store %arg3[%c0_36, %c0_37, %c0_38], %109 {strides = array<i32>} : memref<2x1x256xf32, #tpu.memory_space<vmem>>, vector<1x1x256xf32>,
    %110 = vector.extract_strided_slice %105 {offsets = [1, 0], sizes = [1, 256], strides = [1, 1]} : vector<2x256xf32> to vector<1x256xf32>
    %c1_39 = arith.constant 1 : index
    %c0_40 = arith.constant 0 : index
    %c0_41 = arith.constant 0 : index
    %111 = vector.load %arg3[%c1_39, %c0_40, %c0_41] : memref<2x1x256xf32, #tpu.memory_space<vmem>>, vector<1x1x256xf32>
    %112 = vector.shape_cast %111 : vector<1x1x256xf32> to vector<1x256xf32>
    %113 = vector.shape_cast %110 : vector<1x256xf32> to vector<1x1x256xf32>
    tpu.vector_store %arg3[%c1_39, %c0_40, %c0_41], %113 {strides = array<i32>} : memref<2x1x256xf32, #tpu.memory_space<vmem>>, vector<1x1x256xf32>,
    return
  }
  func.func @transform_0(%arg0: i32) -> (i32, i32, i32) {
    %c0_i32 = arith.constant 0 : i32
    %c0_i32_0 = arith.constant 0 : i32
    %c0_i32_1 = arith.constant 0 : i32
    return %arg0, %c0_i32, %c0_i32_0 : i32, i32, i32
  }
  func.func @transform_1(%arg0: i32) -> (i32, i32) {
    %c0_i32 = arith.constant 0 : i32
    %c0_i32_0 = arith.constant 0 : i32
    %c0_i32_1 = arith.constant 0 : i32
    return %c0_i32, %c0_i32_0 : i32, i32
  }
  func.func @transform_2(%arg0: i32) -> (i32, i32, i32) {
    %c0_i32 = arith.constant 0 : i32
    %c0_i32_0 = arith.constant 0 : i32
    %c0_i32_1 = arith.constant 0 : i32
    return %arg0, %c0_i32, %c0_i32_0 : i32, i32, i32
  }
}

</mosaic_0001>

<bundles_post_ra>
// kernel: mul.13
= control target key start
LH: loop header
LB: loop body
LE: loop exit
PB: predicated region body
PF: predicated region fallthrough
CT: control target
= control target key end

     0   :  { %vm8_vm0 = vcmask 23552   ;;  %s33_s8 = smov 3   ;;  %vm14_vm1 = vcmask 72752   ;;  %vm20_vm2 = vcmask 48152   ;;  %s50_s0 = inlined_call_operand.vmem [shape: f32[3,3], index: 0, kind: input, shape index: {}]   ;;  %s51_s1 = inlined_call_operand.vmem [shape: f32[9], index: 1, kind: output, shape index: {}]  }
   0x1   :  { %v5_v0 = vld [vmem:[%s50_s0] sm:$0xf]  ;;  %s32_s0 = smov 6  }
   0x2   :  { %6 = vst [vmem:[#allocation1] sm:$0xf] %v5_v0 }
   0x9   :  { %v11_v1 = vld [vmem:[#allocation1 + $0x2] sm:$0x1]   ;;  %v7_v2 = vld [vmem:[#allocation1] sm:$0x1]   ;;  %v17_v3 = vld [vmem:[#allocation1 + $0x1] sm:$0x1]  }
   0xa   :  { %12 = vrot.lane.b32.xlu0 %v11_v1, %s32_s0  ;;  %9 = vst.msk [vmem:[#allocation0] sm:$0x1] %vm8_vm0, %v7_v2  }
   0xe   :  { %18 = vrot.lane.b32.xlu0 %v17_v3, %s33_s8 }
  0x7c   :  { %v13_v4 = vpop.permute.xlu0 %12  }
  0x7d   :  { %15 = vst.msk [vmem:[#allocation0] sm:$0x1] %vm14_vm1, %v13_v4  }
  0x80   :  { %v19_v5 = vpop.permute.xlu0 %18  }
  0x81   :  { %21 = vst.msk [vmem:[#allocation0] sm:$0x1] %vm20_vm2, %v19_v5  }
  0x88   :  { %v26_v6 = vld [vmem:[#allocation0] sm:$0x1] }
  0x89   :  { %29 = vst [vmem:[%s51_s1] sm:$0x1] %v26_v6 }

// kernel: spatial_attention.1
= control target key start
LH: loop header
LB: loop body
LE: loop exit
PB: predicated region body
PF: predicated region fallthrough
CT: control target
= control target key end

     0   :  { %vm15_vm0 = vcmask 1043456   ;;  %vm77_vm1 = vcmask 1040384   ;;  %s582_s13 = smov 16   ;;  %s583_s14 = smov 15   ;;  %s883_s0 = inlined_call_operand.vmem [shape: f32[2,4,256], index: 0, kind: input, shape index: {}]   ;;  %s884_s1 = inlined_call_operand.vmem [shape: f32[18,256], index: 1, kind: input, shape index: {}]   ;;  %s885_s2 = inlined_call_operand.vmem [shape: f32[2,1,256], index: 2, kind: output, shape index: {}]  }
   0x1   :  { %v11_v0 = vld [vmem:[%s883_s0] sm:$0xff]  ;;  %v541_v1 = vld [vmem:[%s883_s0 + $0x8] sm:$0xff]  ;;  %s581_s0 = smov 17   ;;  %s584_s19 = smov 1  }
   0x2   :  { %v30_v2 = vsel %vm15_vm0, %v11_v0, -inf  ;;  %v63_v3 = vsel %vm15_vm0, %v541_v1, -inf  ;;  %v16_v4 = vsel %vm15_vm0, %v11_v0, 0.0  ;;  %v49_v5 = vsel %vm15_vm0, %v541_v1, 0.0  ;;  %s585_s20 = smov 127   ;;  %s586_s21 = smov 113  }
   0x3   :  { %v31_v6 = vrot.slane %v30_v2, 4  ;;  %v64_v7 = vrot.slane %v63_v3, 4  ;;  %v17_v8 = vrot.slane %v16_v4, 4  ;;  %v50_v9 = vrot.slane %v49_v5, 4  ;;  %s587_s22 = smov 112   ;;  %s588_s23 = smov 111  }
   0x4   :  { %v13_v10 = vcombine.high %v11_v0, %v11_v0  ;;  %v47_v11 = vcombine.high %v541_v1, %v541_v1  ;;  %v86_v0 = vlaneseq }
   0x5   :  { %v32_v12 = vmax.f32 %v30_v2, %v31_v6  ;;  %v65_v13 = vmax.f32 %v63_v3, %v64_v7  ;;  %v18_v14 = vadd.f32 %v17_v8, %v16_v4  ;;  %v51_v15 = vadd.f32 %v50_v9, %v49_v5  ;;  %v549_v4 = vld [vmem:[%s884_s1 + $0x4] ss:$8 sm:$0x3]  ;;  %v550_v5 = vld [vmem:[%s884_s1 + $0x15] ss:$8 sm:$0x3] }
   0x6   :  { %v37_v16 = vsel %vm15_vm0, %v13_v10, -inf  ;;  %v70_v17 = vsel %vm15_vm0, %v47_v11, -inf  ;;  %v23_v18 = vsel %vm15_vm0, %v13_v10, 0.0  ;;  %v56_v19 = vsel %vm15_vm0, %v47_v11, 0.0 }
   0x7   :  { %v33_v20 = vrot.slane %v32_v12, 2  ;;  %v66_v21 = vrot.slane %v65_v13, 2  ;;  %v19_v22 = vrot.slane %v18_v14, 2  ;;  %v52_v23 = vrot.slane %v51_v15, 2 }
   0x8   :  { %v38_v24 = vrot.slane %v37_v16, 4  ;;  %v71_v25 = vrot.slane %v70_v17, 4  ;;  %v24_v26 = vrot.slane %v23_v18, 4  ;;  %v57_v27 = vrot.slane %v56_v19, 4 }
   0x9   :  { %v34_v28 = vmax.f32 %v32_v12, %v33_v20  ;;  %v67_v29 = vmax.f32 %v65_v13, %v66_v21  ;;  %v20_v30 = vadd.f32 %v19_v22, %v18_v14  ;;  %v53_v31 = vadd.f32 %v52_v23, %v51_v15 }
   0xa   :  { %v39_v32 = vmax.f32 %v37_v16, %v38_v24  ;;  %v72_v33 = vmax.f32 %v70_v17, %v71_v25  ;;  %v25_v34 = vadd.f32 %v24_v26, %v23_v18  ;;  %v58_v35 = vadd.f32 %v57_v27, %v56_v19 }
   0xb   :  { %v35_v36 = vrot.slane %v34_v28, 1  ;;  %v68_v37 = vrot.slane %v67_v29, 1  ;;  %v21_v38 = vrot.slane %v20_v30, 1  ;;  %v54_v39 = vrot.slane %v53_v31, 1 }
   0xc   :  { %v40_v40 = vrot.slane %v39_v32, 2  ;;  %v73_v41 = vrot.slane %v72_v33, 2  ;;  %v26_v42 = vrot.slane %v25_v34, 2  ;;  %v59_v43 = vrot.slane %v58_v35, 2 }
   0xd   :  { %v36_v44 = vmax.f32 %v34_v28, %v35_v36  ;;  %v69_v45 = vmax.f32 %v67_v29, %v68_v37  ;;  %v22_v46 = vadd.f32 %v21_v38, %v20_v30  ;;  %v55_v47 = vadd.f32 %v54_v39, %v53_v31  ;;  %v542_v31 = vld [vmem:[%s884_s1 + $0x11] ss:$8 sm:$0x3]  ;;  %v693_v36 = vld [vmem:[%s884_s1 + $0x2] ss:$8 sm:$0x3] }
   0xe   :  { %v41_v48 = vmax.f32 %v39_v32, %v40_v40  ;;  %v74_v49 = vmax.f32 %v72_v33, %v73_v41  ;;  %v27_v50 = vadd.f32 %v26_v42, %v25_v34  ;;  %v60_v51 = vadd.f32 %v59_v43, %v58_v35  ;;  %v543_v33 = vld [vmem:[%s884_s1 + $0x1] ss:$8 sm:$0x3]  ;;  %v544_v34 = vld [vmem:[%s884_s1 + $0x12] ss:$8 sm:$0x3] }
   0xf   :  { %v620_v52 = vsel %vm77_vm1, %v36_v44, %v69_v45  ;;  %v623_v53 = vsel %vm77_vm1, %v22_v46, %v55_v47  ;;  %v632_v1 = vshrl.u32 %v86_v0, 7  ;;  %v677_v30 = vand.u32 127, %v86_v0  ;;  %v97_v38 = vld [vmem:[%s884_s1] ss:$8 sm:$0x3] }
  0x10   :  { %91 = vrot.lane.b32.xlu1 %v620_v52, %s581_s0  ;;  %82 = vrot.lane.b32.xlu0 %v623_v53, %s581_s0  ;;  %v42_v54 = vrot.slane %v41_v48, 1  ;;  %v75_v55 = vrot.slane %v74_v49, 1  ;;  %v28_v56 = vrot.slane %v27_v50, 1  ;;  %v61_v57 = vrot.slane %v60_v51, 1 }
  0x11   :  { %v636_v2 = vsub.s32 0, %v632_v1  ;;  %v639_v3 = vsub.s32 1, %v632_v1  ;;  %vm88_vm2 = vcmp.lt.s32.totalorder %v677_v30, 17  ;;  %vm132_vm3 = vcmp.lt.s32.totalorder %v677_v30, 16 }
  0x12   :  { %v43_v58 = vmax.f32 %v41_v48, %v42_v54  ;;  %v76_v59 = vmax.f32 %v74_v49, %v75_v55  ;;  %v29_v60 = vadd.f32 %v28_v56, %v27_v50  ;;  %v62_v61 = vadd.f32 %v61_v57, %v60_v51  ;;  %v546_v39 = vld [vmem:[%s884_s1 + $0x13] ss:$8 sm:$0x3]  ;;  %v709_v44 = vld [vmem:[%s884_s1 + $0x3] ss:$8 sm:$0x3] }
  0x13   :  { %v275_v6 = vrot.slane %v549_v4, %v636_v2  ;;  %v279_v7 = vrot.slane %v549_v4, %v639_v3  ;;  %v290_v8 = vrot.slane %v550_v5, %v636_v2  ;;  %v294_v9 = vrot.slane %v550_v5, %v639_v3  ;;  %v548_v45 = vld [vmem:[%s884_s1 + $0x14] ss:$8 sm:$0x3]  ;;  %v727_v51 = vld [vmem:[%s884_s1 + $0x5] ss:$8 sm:$0x3] }
  0x14   :  { %128 = vrot.lane.b32.xlu0 %v623_v53, %s582_s13  ;;  %v81_v62 = vsel %vm77_vm1, %v43_v58, %v76_v59  ;;  %v79_v63 = vsel %vm77_vm1, %v29_v60, %v62_v61  ;;  %v117_v37 = vrot.slane %v542_v31, %v636_v2  ;;  %v121_v40 = vrot.slane %v542_v31, %v639_v3  ;;  %v742_v59 = vld [vmem:[%s884_s1 + $0x16] ss:$8 sm:$0x3] }
  0x15   :  { %93 = vrot.lane.b32.xlu1 %v81_v62, %s581_s0  ;;  %v282_v10 = vmul.f32 %v275_v6, %v623_v53  ;;  %v297_v11 = vmul.f32 %v290_v8, %v620_v52  ;;  %v298_v12 = vmul.f32 %v294_v9, %v81_v62  ;;  %v283_v13 = vmul.f32 %v279_v7, %v79_v63 }
  0x16   :  { %v147_v41 = vrot.slane %v543_v33, %v636_v2  ;;  %v151_v42 = vrot.slane %v543_v33, %v639_v3  ;;  %v162_v43 = vrot.slane %v544_v34, %v636_v2  ;;  %v166_v47 = vrot.slane %v544_v34, %v639_v3 }
  0x17   :  { %v654_v14 = vadd.f32 %v297_v11, %v282_v10  ;;  %v656_v15 = vadd.f32 %v298_v12, %v283_v13  ;;  %vm179_vm4 = vcmp.lt.s32.totalorder %v677_v30, 15  ;;  %v194_v48 = vrot.slane %v693_v36, %v636_v2 }
  0x18   :  { %135 = vrot.lane.b32.xlu0 %v620_v52, %s582_s13  ;;  %v198_v49 = vrot.slane %v693_v36, %v639_v3  ;;  %v209_v54 = vrot.slane %v546_v39, %v636_v2  ;;  %v213_v55 = vrot.slane %v546_v39, %v639_v3  ;;  %vm226_vm5 = vcmp.lt.s32.totalorder %v677_v30, 1 }
  0x19   :  { %130 = vrot.lane.b32.xlu1 %v79_v63, %s582_s13  ;;  %v241_v56 = vrot.slane %v709_v44, %v636_v2  ;;  %v245_v57 = vrot.slane %v709_v44, %v639_v3  ;;  %v256_v58 = vrot.slane %v548_v45, %v636_v2  ;;  %v326_v12 = vrot.slane %v727_v51, %v639_v3 }
  0x1a   :  { %v337_v13 = vrot.slane %v742_v59, %v636_v2  ;;  %vm307_vm6 = vcmp.lt.s32.totalorder %v677_v30, 127  ;;  %vm354_vm7 = vcmp.lt.s32.totalorder %v677_v30, 113  ;;  %vm401_vm8 = vcmp.lt.s32.totalorder %v677_v30, 112 }
  0x1b   :  { %vm448_vm9 = vcmp.lt.s32.totalorder %v677_v30, 111  ;;  %v589_v30 = vmov 1966171168   ;;  %vm523_vm10 = vcmp.lt.s32.totalorder %v86_v0, 256 }
  0x1c   :  { %175 = vrot.lane.b32.xlu0 %v623_v53, %s583_s14 }
  0x1d   :  { %137 = vrot.lane.b32.xlu1 %v81_v62, %s582_s13 }
  0x20   :  { %84 = vrot.lane.b32.xlu0 %v79_v63, %s581_s0 }
  0x21   :  { %177 = vrot.lane.b32.xlu1 %v79_v63, %s583_s14 }
  0x24   :  { %182 = vrot.lane.b32.xlu0 %v620_v52, %s583_s14 }
  0x25   :  { %184 = vrot.lane.b32.xlu1 %v81_v62, %s583_s14 }
  0x28   :  { %222 = vrot.lane.b32.xlu0 %v623_v53, %s584_s19 }
  0x29   :  { %224 = vrot.lane.b32.xlu1 %v79_v63, %s584_s19 }
  0x2c   :  { %229 = vrot.lane.b32.xlu0 %v620_v52, %s584_s19 }
  0x2d   :  { %231 = vrot.lane.b32.xlu1 %v81_v62, %s584_s19 }
  0x30   :  { %303 = vrot.lane.b32.xlu0 %v623_v53, %s585_s20 }
  0x31   :  { %305 = vrot.lane.b32.xlu1 %v79_v63, %s585_s20 }
  0x34   :  { %310 = vrot.lane.b32.xlu0 %v620_v52, %s585_s20 }
  0x35   :  { %312 = vrot.lane.b32.xlu1 %v81_v62, %s585_s20 }
  0x38   :  { %350 = vrot.lane.b32.xlu0 %v623_v53, %s586_s21 }
  0x39   :  { %352 = vrot.lane.b32.xlu1 %v79_v63, %s586_s21 }
  0x3c   :  { %357 = vrot.lane.b32.xlu0 %v620_v52, %s586_s21 }
  0x3d   :  { %359 = vrot.lane.b32.xlu1 %v81_v62, %s586_s21 }
  0x40   :  { %397 = vrot.lane.b32.xlu0 %v623_v53, %s587_s22 }
  0x41   :  { %399 = vrot.lane.b32.xlu1 %v79_v63, %s587_s22 }
  0x44   :  { %404 = vrot.lane.b32.xlu0 %v620_v52, %s587_s22 }
  0x45   :  { %406 = vrot.lane.b32.xlu1 %v81_v62, %s587_s22 }
  0x48   :  { %444 = vrot.lane.b32.xlu0 %v623_v53, %s588_s23  ;;  %v106_v53 = vrot.slane %v97_v38, %v639_v3 }
  0x49   :  { %446 = vrot.lane.b32.xlu1 %v79_v63, %s588_s23  ;;  %v322_v63 = vrot.slane %v727_v51, %v636_v2  ;;  %v557_v51 = vld [vmem:[%s884_s1 + $0x10] ss:$8 sm:$0x3] }
  0x4c   :  { %451 = vrot.lane.b32.xlu0 %v620_v52, %s588_s23  ;;  %v102_v52 = vrot.slane %v97_v38, %v636_v2 }
  0x4d   :  { %453 = vrot.lane.b32.xlu1 %v81_v62, %s588_s23  ;;  %v260_v62 = vrot.slane %v548_v45, %v639_v3 }
  0x82   :  { %v92_v16 = vpop.permute.xlu1 %91  ;;  %v83_v17 = vpop.permute.xlu0 %82 }
  0x86   :  { %v129_v18 = vpop.permute.xlu0 %128 }
  0x87   :  { %v94_v19 = vpop.permute.xlu1 %93 }
  0x88   :  { %v95_v5 = vsel %vm88_vm2, %v92_v16, %v94_v19  ;;  %v96_v6 = vsel %vm88_vm2, %v94_v19, %v92_v16 }
  0x8a   :  { %v136_v20 = vpop.permute.xlu0 %135 }
  0x8b   :  { %v131_v21 = vpop.permute.xlu1 %130 }
  0x8c   :  { %v133_v10 = vsel %vm132_vm3, %v129_v18, %v131_v21  ;;  %v134_v11 = vsel %vm132_vm3, %v131_v21, %v129_v18 }
  0x8d   :  { %v155_v38 = vmul.f32 %v151_v42, %v133_v10 }
  0x8e   :  { %v668_v22 = vpop.permute.xlu0 %175 }
  0x8f   :  { %v138_v23 = vpop.permute.xlu1 %137 }
  0x90   :  { %v139_v7 = vsel %vm132_vm3, %v136_v20, %v138_v23  ;;  %v140_v8 = vsel %vm132_vm3, %v138_v23, %v136_v20  ;;  %v124_v23 = vmul.f32 %v117_v37, %v96_v6  ;;  %v154_v37 = vmul.f32 %v147_v41, %v134_v11  ;;  %v553_v41 = vld [vmem:[%s884_s1 + $0x6] ss:$8 sm:$0x3] }
  0x91   :  { %v169_v31 = vmul.f32 %v162_v43, %v140_v8  ;;  %v170_v18 = vmul.f32 %v166_v47, %v139_v7 }
  0x92   :  { %v85_v24 = vpop.permute.xlu0 %84 }
  0x93   :  { %v670_v25 = vpop.permute.xlu1 %177  ;;  %v89_v60 = vsel %vm88_vm2, %v83_v17, %v85_v24  ;;  %v90_v61 = vsel %vm88_vm2, %v85_v24, %v83_v17  ;;  %v125_v24 = vmul.f32 %v121_v40, %v95_v5  ;;  %v369_v5 = vrot.slane %v553_v41, %v636_v2 }
  0x94   :  { %v109_v16 = vmul.f32 %v102_v52, %v90_v61  ;;  %v110_v17 = vmul.f32 %v106_v53, %v89_v60  ;;  %v180_v33 = vsel %vm179_vm4, %v668_v22, %v670_v25  ;;  %v181_v34 = vsel %vm179_vm4, %v670_v25, %v668_v22 }
  0x95   :  { %v201_v25 = vmul.f32 %v194_v48, %v181_v34  ;;  %v202_v47 = vmul.f32 %v198_v49, %v180_v33  ;;  %v171_v52 = vadd.f32 %v169_v31, %v154_v37  ;;  %v172_v53 = vadd.f32 %v170_v18, %v155_v38  ;;  %v554_v48 = vld [vmem:[%s884_s1 + $0x17] ss:$8 sm:$0x3]  ;;  %v555_v49 = vld [vmem:[%s884_s1 + $0x7] ss:$8 sm:$0x3] }
  0x96   :  { %v183_v26 = vpop.permute.xlu0 %182  ;;  %v126_v43 = vadd.f32 %v124_v23, %v109_v16  ;;  %v127_v44 = vadd.f32 %v125_v24, %v110_v17  ;;  %v384_v10 = vrot.slane %v554_v48, %v636_v2  ;;  %v388_v11 = vrot.slane %v554_v48, %v639_v3 }
  0x97   :  { %v185_v27 = vpop.permute.xlu1 %184  ;;  %v416_v17 = vrot.slane %v555_v49, %v636_v2 }
  0x98   :  { %v186_v19 = vsel %vm179_vm4, %v183_v26, %v185_v27  ;;  %v187_v20 = vsel %vm179_vm4, %v185_v27, %v183_v26 }
  0x99   :  { %v216_v39 = vmul.f32 %v209_v54, %v187_v20  ;;  %v217_v40 = vmul.f32 %v213_v55, %v186_v19  ;;  %v341_v54 = vrot.slane %v742_v59, %v639_v3  ;;  %v373_v59 = vrot.slane %v553_v41, %v639_v3  ;;  %v556_v19 = vld [vmem:[%s884_s1 + $0x20] ss:$8 sm:$0x3]  ;;  %v558_v41 = vld [vmem:[%s884_s1 + $0x21] ss:$8 sm:$0x3] }
  0x9a   :  { %v672_v28 = vpop.permute.xlu0 %222  ;;  %v435_v37 = vrot.slane %v556_v19, %v639_v3 }
  0x9b   :  { %v674_v29 = vpop.permute.xlu1 %224  ;;  %v218_v60 = vadd.f32 %v216_v39, %v201_v25  ;;  %v219_v61 = vadd.f32 %v217_v40, %v202_v47  ;;  %v420_v25 = vrot.slane %v555_v49, %v639_v3 }
  0x9c   :  { %v227_v45 = vsel %vm226_vm5, %v672_v28, %v674_v29  ;;  %v228_v22 = vsel %vm226_vm5, %v674_v29, %v672_v28 }
  0x9d   :  { %v248_v28 = vmul.f32 %v241_v56, %v228_v22  ;;  %v249_v29 = vmul.f32 %v245_v57, %v227_v45 }
  0x9e   :  { %v230_v32 = vpop.permute.xlu0 %229 }
  0x9f   :  { %v232_v35 = vpop.permute.xlu1 %231 }
  0xa0   :  { %v233_v26 = vsel %vm226_vm5, %v230_v32, %v232_v35  ;;  %v234_v27 = vsel %vm226_vm5, %v232_v35, %v230_v32 }
  0xa1   :  { %v263_v32 = vmul.f32 %v256_v58, %v234_v27  ;;  %v264_v35 = vmul.f32 %v260_v62, %v233_v26  ;;  %v173_v58 = vadd.f32 %v171_v52, %v126_v43  ;;  %v174_v62 = vadd.f32 %v172_v53, %v127_v44 }
  0xa2   :  { %v714_v46 = vpop.permute.xlu0 %303  ;;  %v431_v27 = vrot.slane %v556_v19, %v636_v2 }
  0xa3   :  { %v722_v50 = vpop.permute.xlu1 %305  ;;  %v265_v6 = vadd.f32 %v263_v32, %v248_v28  ;;  %v266_v7 = vadd.f32 %v264_v35, %v249_v29  ;;  %v220_v20 = vadd.f32 %v218_v60, %v173_v58  ;;  %v221_v23 = vadd.f32 %v219_v61, %v174_v62 }
  0xa4   :  { %v478_v58 = vrot.slane %v558_v41, %v636_v2  ;;  %v482_v62 = vrot.slane %v558_v41, %v639_v3 }
  0xa5   :  { %v267_v34 = vadd.f32 %v265_v6, %v220_v20  ;;  %v268_v26 = vadd.f32 %v266_v7, %v221_v23 }
  0xa6   :  { %v311_v4 = vpop.permute.xlu0 %310 }
  0xa7   :  { %v313_v9 = vpop.permute.xlu1 %312  ;;  %v301_v60 = vadd.f32 %v654_v14, %v267_v34  ;;  %v302_v61 = vadd.f32 %v656_v15, %v268_v26 }
  0xa8   :  { %v314_v56 = vsel %vm307_vm6, %v311_v4, %v313_v9  ;;  %v315_v57 = vsel %vm307_vm6, %v313_v9, %v311_v4  ;;  %v308_v4 = vsel %vm307_vm6, %v714_v46, %v722_v50  ;;  %v309_v9 = vsel %vm307_vm6, %v722_v50, %v714_v46 }
  0xa9   :  { %v344_v24 = vmul.f32 %v337_v13, %v314_v56  ;;  %v345_v31 = vmul.f32 %v341_v54, %v315_v57  ;;  %v329_v39 = vmul.f32 %v322_v63, %v308_v4  ;;  %v330_v46 = vmul.f32 %v326_v12, %v309_v9 }
  0xaa   :  { %v772_v21 = vpop.permute.xlu0 %350  ;;  %v463_v54 = vrot.slane %v557_v51, %v636_v2 }
  0xab   :  { %v353_v36 = vpop.permute.xlu1 %352  ;;  %v346_v12 = vadd.f32 %v344_v24, %v329_v39  ;;  %v347_v22 = vadd.f32 %v345_v31, %v330_v46 }
  0xac   :  { %v355_v50 = vsel %vm354_vm7, %v772_v21, %v353_v36  ;;  %v356_v13 = vsel %vm354_vm7, %v353_v36, %v772_v21 }
  0xad   :  { %v376_v21 = vmul.f32 %v369_v5, %v355_v50  ;;  %v377_v36 = vmul.f32 %v373_v59, %v356_v13  ;;  %v348_v5 = vadd.f32 %v346_v12, %v301_v60  ;;  %v349_v59 = vadd.f32 %v347_v22, %v302_v61 }
  0xae   :  { %v358_v42 = vpop.permute.xlu0 %357 }
  0xaf   :  { %v360_v55 = vpop.permute.xlu1 %359 }
  0xb0   :  { %v361_v18 = vsel %vm354_vm7, %v358_v42, %v360_v55  ;;  %v362_v33 = vsel %vm354_vm7, %v360_v55, %v358_v42  ;;  %v467_v55 = vrot.slane %v557_v51, %v639_v3 }
  0xb1   :  { %v391_v43 = vmul.f32 %v384_v10, %v361_v18  ;;  %v392_v44 = vmul.f32 %v388_v11, %v362_v33 }
  0xb2   :  { %v398_v8 = vpop.permute.xlu0 %397 }
  0xb3   :  { %v400_v16 = vpop.permute.xlu1 %399  ;;  %v393_v28 = vadd.f32 %v391_v43, %v376_v21  ;;  %v394_v29 = vadd.f32 %v392_v44, %v377_v36 }
  0xb4   :  { %v402_v47 = vsel %vm401_vm8, %v398_v8, %v400_v16  ;;  %v403_v32 = vsel %vm401_vm8, %v400_v16, %v398_v8 }
  0xb5   :  { %v423_v48 = vmul.f32 %v416_v17, %v402_v47  ;;  %v424_v49 = vmul.f32 %v420_v25, %v403_v32  ;;  %v395_v8 = vadd.f32 %v393_v28, %v348_v5  ;;  %v396_v10 = vadd.f32 %v394_v29, %v349_v59 }
  0xb6   :  { %v405_v38 = vpop.permute.xlu0 %404 }
  0xb7   :  { %v407_v40 = vpop.permute.xlu1 %406 }
  0xb8   :  { %v408_v45 = vsel %vm401_vm8, %v405_v38, %v407_v40  ;;  %v409_v63 = vsel %vm401_vm8, %v407_v40, %v405_v38  ;;  %v507_v38 = vunpack.c.l.s4 %v589_v30 }
  0xb9   :  { %v438_v42 = vmul.f32 %v431_v27, %v408_v45  ;;  %v439_v52 = vmul.f32 %v435_v37, %v409_v63 }
  0xba   :  { %v445_v35 = vpop.permute.xlu0 %444  ;;  %v508_v39 = vunpack.c.0.s8 %v507_v38 }
  0xbb   :  { %v447_v53 = vpop.permute.xlu1 %446  ;;  %v440_v14 = vadd.f32 %v438_v42, %v423_v48  ;;  %v441_v57 = vadd.f32 %v439_v52, %v424_v49 }
  0xbc   :  { %v449_v6 = vsel %vm448_vm9, %v445_v35, %v447_v53  ;;  %v450_v7 = vsel %vm448_vm9, %v447_v53, %v445_v35  ;;  %v511_v50 = vsub.s32 %v508_v39, %v632_v1 }
  0xbd   :  { %v470_v3 = vmul.f32 %v463_v54, %v449_v6  ;;  %v471_v16 = vmul.f32 %v467_v55, %v450_v7  ;;  %v442_v20 = vadd.f32 %v440_v14, %v395_v8  ;;  %v443_v23 = vadd.f32 %v441_v57, %v396_v10 }
  0xbe   :  { %v452_v56 = vpop.permute.xlu0 %451 }
  0xbf   :  { %v454_v15 = vpop.permute.xlu1 %453 }
  0xc0   :  { %v455_v11 = vsel %vm448_vm9, %v452_v56, %v454_v15  ;;  %v456_v2 = vsel %vm448_vm9, %v454_v15, %v452_v56 }
  0xc1   :  { %v485_v17 = vmul.f32 %v478_v58, %v455_v11  ;;  %v486_v19 = vmul.f32 %v482_v62, %v456_v2 }
  0xc3   :  { %v487_v4 = vadd.f32 %v485_v17, %v470_v3  ;;  %v488_v9 = vadd.f32 %v486_v19, %v471_v16 }
  0xc5   :  { %v489_v24 = vadd.f32 %v487_v4, %v442_v20  ;;  %v490_v31 = vadd.f32 %v488_v9, %v443_v23 }
  0xc7   :  { %v559_v18 = vmul.f32 -1.442695, %v489_v24  ;;  %v560_v33 = vmul.f32 -1.442695, %v490_v31 }
  0xc9   :  { %573 = vpow2.f32 %v559_v18 }
  0xca   :  { %575 = vpow2.f32 %v560_v33 }
  0xd6   :  { %v574_v34 = vpop.eup %573 }
  0xd7   :  { %v576_v26 = vpop.eup %575  ;;  %v497_v27 = vadd.f32 1.0, %v574_v34 }
  0xd8   :  { %v498_v37 = vadd.f32 1.0, %v576_v26 }
  0xd9   :  { %577 = vrcp.f32 %v497_v27 }
  0xda   :  { %579 = vrcp.f32 %v498_v37 }
  0xe6   :  { %v578_v46 = vpop.eup %577 }
  0xe7   :  { %v580_v13 = vpop.eup %579 }
  0xe8   :  { %v505_v40 = vcombine.low %v578_v46, %v580_v13 }
  0xea   :  { %v512_v43 = vrot.slane %v505_v40, %v511_v50 }
  0xec   :  { %v519_v44 = vrot.slane %v512_v43, %v511_v50  ;;  %v526_v45 = vcombine.high %v512_v43, %v512_v43 }
  0xee   :  { %525 = vst.msk [vmem:[%s885_s2] sm:$0x3] %vm523_vm10, %v519_v44  ;;  %v533_v63 = vrot.slane %v526_v45, %v511_v50 }
  0xf0   :  { %561 = vst.msk [vmem:[%s885_s2 + $0x2] sm:$0x3] %vm523_vm10, %v533_v63 }

</bundles_post_ra>
